<compile_context>
chip_gen: v7x
topology: tpu7x:2x2x1
jax: 0.10.0
libtpu: 0.0.40
codegen_flags: <defaults>
</compile_context>

<pallas_src>
import jax
import jax.numpy as jnp
from jax.experimental import pallas as pl
from jax.experimental.pallas import tpu as pltpu

_LANES = 128
_ROW_ALIGN = 32          # int8 native sublane tile (also satisfies f32's 8)
_MAX_BLOCK_ROWS = 8192   # 8192x128: 4 MiB f32 + 1 MiB int8; ~10 MiB double-buffered


def _round_up(x, m):
    return -(-x // m) * m


def _make_kernel(two_d: bool):
    def kernel(out_ref, code_ref, loss_acc_ref):
        step = pl.program_id(1) if two_d else pl.program_id(0)

        @pl.when(step == 0)
        def _init():
            loss_acc_ref[...] = jnp.zeros_like(loss_acc_ref)

        p = out_ref[...].astype(jnp.float32)       # (R, 128) probabilities
        # code: 0 = invalid / padding, 1 = target class, 2 = non-target class.
        # (widen once to i32 so all masks live in a plain 32-bit layout)
        code = code_ref[...].astype(jnp.int32)

        # BCE with a single log (select-then-log) + torch's -100 clamp.
        sel = jnp.where(code == 1, p, 1.0 - p)
        bce = -jnp.maximum(jnp.log(sel), -100.0)

        # Select (not multiply) so NaN/garbage in invalid / ragged-tail lanes
        # never propagates into the sum (matches torch's loss[valid]).
        contrib = jnp.where(code != 0, bce, 0.0)
        loss_acc_ref[...] += jnp.sum(contrib, axis=0, keepdims=True)

    return kernel


def gender_cls_loss(out, gt, *, max_block_rows=_MAX_BLOCK_ROWS):
    """out: (N, 2) probabilities (any float dtype); gt: (N,) ints in {0,1,2}."""
    n = out.shape[0]
    flat_len = 2 * n

    # ---- wrapper-side prep: purely elementwise, fuses into one cheap pass ----
    # Fold one-hot target + validity into a single int8 stream (2N bytes).
    gt_col = gt.reshape(n, 1)
    target = gt_col == jnp.asarray([[1, 2]], dtype=gt.dtype)            # (N, 2) bool
    code = jnp.where(gt_col != 0,
                     jnp.where(target, jnp.int8(1), jnp.int8(2)),
                     jnp.int8(0))                                        # (N, 2) int8

    # Denominator of the mean: done on the small int stream in the wrapper so the
    # kernel hot loop carries a single accumulator.
    count = (2 * jnp.count_nonzero(gt)).astype(jnp.float32)

    # ---- lane-dense (rows, 128) layout -----------------------------------
    rows = -(-flat_len // _LANES)
    block_rows = _round_up(min(max_block_rows, _round_up(rows, _ROW_ALIGN)), _ROW_ALIGN)
    num_blocks = -(-rows // block_rows)

    # Split across TensorCores only where 2 TCs exist (v7x); on v5e/v6e a part
    # axis is pure bookkeeping overhead.
    kind = jax.devices()[0].device_kind.lower()
    two_cores = ("v7" in kind or "tpu7" in kind) and num_blocks >= 2
    if two_cores:
        num_parts = 2
        num_blocks = _round_up(num_blocks, 2)
        blocks_per_part = num_blocks // 2
    else:
        num_parts = 1
        blocks_per_part = num_blocks

    # `out`: pad only up to the next 128-lane boundary (<=127 elems; zero pad
    # when 2N % 128 == 0). No block-sized pad of the dominant f32 stream.
    # TODO(synk): if the producer can emit bf16 probabilities, feed them through
    # unchanged (kernel accumulates in f32) to halve the dominant HBM stream.
    pad_out = rows * _LANES - flat_len
    out_flat = out.reshape(flat_len)
    if pad_out:
        out_flat = jnp.pad(out_flat, (0, pad_out), constant_values=0.5)
    out2d = out_flat.reshape(rows, _LANES)

    # `code`: pad (cheap, int8) to the full grid extent so no block ever reads
    # garbage validity bits; the grid's ragged `out` tail is masked through it.
    rows_grid = num_blocks * block_rows
    code_flat = jnp.pad(code.reshape(flat_len), (0, rows_grid * _LANES - flat_len))
    code2d = code_flat.reshape(rows_grid, _LANES)

    # Clamp insurance for `out` block indices (only relevant when the 2-part
    # grid rounds num_blocks up); duplicate reads are code-masked to zero.
    last_ok_block = (rows - 1) // block_rows

    if two_cores:
        grid = (num_parts, blocks_per_part)
        out_map = lambda c, i: (jnp.minimum(c * blocks_per_part + i, last_ok_block), 0)
        code_map = lambda c, i: (c * blocks_per_part + i, 0)
        acc_map = lambda c, i: (c, 0)
        dims = (pltpu.CORE_PARALLEL, pltpu.ARBITRARY)
    else:
        grid = (blocks_per_part,)
        out_map = lambda i: (jnp.minimum(i, last_ok_block), 0)
        code_map = lambda i: (i, 0)
        acc_map = lambda i: (0, 0)
        dims = ("arbitrary",)

    loss_parts = pl.pallas_call(
        _make_kernel(two_cores),
        grid=grid,
        in_specs=[
            pl.BlockSpec((block_rows, _LANES), out_map),
            pl.BlockSpec((block_rows, _LANES), code_map),
        ],
        out_specs=pl.BlockSpec((1, _LANES), acc_map),
        out_shape=jax.ShapeDtypeStruct((num_parts, _LANES), jnp.float32),
        compiler_params=pltpu.CompilerParams(dimension_semantics=dims),
    )(out2d, code2d)

    # Final lane (+part) reduce and the mean divide: tiny, wrapper-side.
    # 0/0 -> NaN when no valid rows, matching torch.mean of an empty tensor.
    return jnp.sum(loss_parts) / count


def _reference(out, gt):
    valid = gt != 0
    target = jax.nn.one_hot(gt, 3)[:, 1:].astype(jnp.float32)
    log_p = jnp.maximum(jnp.log(out), -100.0)
    log_1mp = jnp.maximum(jnp.log(1.0 - out), -100.0)
    bce = -(target * log_p + (1.0 - target) * log_1mp)
    return bce[valid].mean()


if __name__ == "__main__":
    key = jax.random.PRNGKey(0)
    k1, k2, k3, k4 = jax.random.split(key, 4)

    # Small case (single block).
    N = 8
    out = jax.random.uniform(k1, (N, 2), jnp.float32, minval=0.05, maxval=0.95)
    gt = jax.random.randint(k2, (N,), 0, 3, dtype=jnp.int32)

    loss = gender_cls_loss(out, gt)
    jax.block_until_ready(loss)
    ref = _reference(out, gt)
    assert jnp.allclose(loss, ref, rtol=1e-5, atol=1e-6), (loss, ref)

    # Larger case with a small block size to exercise the multi-block grid,
    # cross-step accumulation, the ragged tail, and (on v7x) the 2-core split.
    N2 = 10000
    out2 = jax.random.uniform(k3, (N2, 2), jnp.float32, minval=0.01, maxval=0.99)
    gt2 = jax.random.randint(k4, (N2,), 0, 3, dtype=jnp.int32)

    loss2 = gender_cls_loss(out2, gt2, max_block_rows=32)
    jax.block_until_ready(loss2)
    ref2 = _reference(out2, gt2)
    assert jnp.allclose(loss2, ref2, rtol=1e-4, atol=1e-5), (loss2, ref2)

    # Default (large-block) path on the same data.
    loss3 = gender_cls_loss(out2, gt2)
    jax.block_until_ready(loss3)
    assert jnp.allclose(loss3, ref2, rtol=1e-4, atol=1e-5), (loss3, ref2)

    print("KERNEL_OK")
</pallas_src>

<mosaic_0001>
module attributes {stable_mosaic.version = 11 : i64} {
  func.func @kernel(%arg0: i32, %arg1: memref<32x128xf32, #tpu.memory_space<vmem>>, %arg2: memref<32x128xi8, #tpu.memory_space<vmem>>, %arg3: memref<1x128xf32, #tpu.memory_space<vmem>>) attributes {dimension_semantics = [#tpu.dimension_semantics<arbitrary>], iteration_bounds = array<i64: 1>, scalar_prefetch = 0 : i64, scratch_operands = 0 : i64, tpu.core_type = #tpu.core_type<tc>, window_params = [{transform_indices = @transform_0, window_bounds = array<i64: 32, 128>}, {transform_indices = @transform_1, window_bounds = array<i64: 32, 128>}, {pipeline_mode = #tpu.pipeline_mode<synchronous>, transform_indices = @transform_2, window_bounds = array<i64: 1, 128>}]} {
    %c0_i32 = arith.constant 0 : i32
    %0 = arith.cmpi eq, %arg0, %c0_i32 : i32
    %1 = arith.extui %0 : i1 to i32
    %c0_i32_0 = arith.constant 0 : i32
    %2 = arith.cmpi ne, %1, %c0_i32_0 : i32
    scf.if %2 {
      %cst_13 = arith.constant 0.000000e+00 : f32
      %25 = vector.broadcast %cst_13 : f32 to vector<1x128xf32>
      %c0_14 = arith.constant 0 : index
      %c0_15 = arith.constant 0 : index
      %26 = vector.load %arg3[%c0_14, %c0_15] : memref<1x128xf32, #tpu.memory_space<vmem>>, vector<1x128xf32>
      tpu.vector_store %arg3[%c0_14, %c0_15], %25 {strides = array<i32>} : memref<1x128xf32, #tpu.memory_space<vmem>>, vector<1x128xf32>,
    } else {
    }
    %c0 = arith.constant 0 : index
    %c0_1 = arith.constant 0 : index
    %3 = vector.load %arg1[%c0, %c0_1] : memref<32x128xf32, #tpu.memory_space<vmem>>, vector<32x128xf32>
    %c0_2 = arith.constant 0 : index
    %c0_3 = arith.constant 0 : index
    %4 = vector.load %arg2[%c0_2, %c0_3] : memref<32x128xi8, #tpu.memory_space<vmem>>, vector<32x128xi8>
    %5 = arith.extsi %4 : vector<32x128xi8> to vector<32x128xi32>
    %c1_i32 = arith.constant 1 : i32
    %6 = vector.broadcast %c1_i32 : i32 to vector<32x128xi32>
    %7 = arith.cmpi eq, %5, %6 : vector<32x128xi32>
    %cst = arith.constant 1.000000e+00 : f32
    %8 = vector.broadcast %cst : f32 to vector<32x128xf32>
    %9 = arith.subf %8, %3 : vector<32x128xf32>
    %10 = arith.select %7, %3, %9 : vector<32x128xi1>, vector<32x128xf32>
    %11 = math.log %10 : vector<32x128xf32>
    %cst_4 = arith.constant -1.000000e+02 : f32
    %12 = vector.broadcast %cst_4 : f32 to vector<32x128xf32>
    %13 = arith.maximumf %11, %12 : vector<32x128xf32>
    %cst_5 = arith.constant 0.000000e+00 : f32
    %14 = vector.broadcast %cst_5 : f32 to vector<32x128xf32>
    %15 = arith.subf %14, %13 : vector<32x128xf32>
    %c0_i32_6 = arith.constant 0 : i32
    %16 = vector.broadcast %c0_i32_6 : i32 to vector<32x128xi32>
    %17 = arith.cmpi ne, %5, %16 : vector<32x128xi32>
    %cst_7 = arith.constant 0.000000e+00 : f32
    %18 = vector.broadcast %cst_7 : f32 to vector<32x128xf32>
    %19 = arith.select %17, %15, %18 : vector<32x128xi1>, vector<32x128xf32>
    %c0_8 = arith.constant 0 : index
    %c0_9 = arith.constant 0 : index
    %20 = vector.load %arg3[%c0_8, %c0_9] : memref<1x128xf32, #tpu.memory_space<vmem>>, vector<1x128xf32>
    %cst_10 = arith.constant dense<0.000000e+00> : vector<128xf32>
    %21 = vector.multi_reduction <add>, %19, %cst_10 [0] : vector<32x128xf32> to vector<128xf32>
    %22 = vector.shape_cast %21 : vector<128xf32> to vector<1x128xf32>
    %23 = arith.addf %20, %22 : vector<1x128xf32>
    %c0_11 = arith.constant 0 : index
    %c0_12 = arith.constant 0 : index
    %24 = vector.load %arg3[%c0_11, %c0_12] : memref<1x128xf32, #tpu.memory_space<vmem>>, vector<1x128xf32>
    tpu.vector_store %arg3[%c0_11, %c0_12], %23 {strides = array<i32>} : memref<1x128xf32, #tpu.memory_space<vmem>>, vector<1x128xf32>,
    return
  }
  func.func @transform_0(%arg0: i32) -> (i32, i32) {
    %c0_i32 = arith.constant 0 : i32
    %0 = arith.minsi %arg0, %c0_i32 : i32
    %c0_i32_0 = arith.constant 0 : i32
    %c0_i32_1 = arith.constant 0 : i32
    return %0, %c0_i32_0 : i32, i32
  }
  func.func @transform_1(%arg0: i32) -> (i32, i32) {
    %c0_i32 = arith.constant 0 : i32
    %c0_i32_0 = arith.constant 0 : i32
    return %arg0, %c0_i32 : i32, i32
  }
  func.func @transform_2(%arg0: i32) -> (i32, i32) {
    %c0_i32 = arith.constant 0 : i32
    %c0_i32_0 = arith.constant 0 : i32
    %c0_i32_1 = arith.constant 0 : i32
    return %c0_i32, %c0_i32_0 : i32, i32
  }
}

</mosaic_0001>

<bundles_post_ra>
// kernel: tpu_custom_call.1
= control target key start
LH: loop header
LB: loop body
LE: loop exit
PB: predicated region body
PF: predicated region fallthrough
CT: control target
= control target key end

     0   :  { %7 = vsyncpa [#allocation3], 0  ;;  %s259_s0 = inlined_call_operand.hbm [shape: f32[1,128], index: 0, kind: input, shape index: {}]   ;;  %s260_s1 = inlined_call_operand.hbm [shape: s8[32,128], index: 1, kind: input, shape index: {}]   ;;  %s261_s2 = inlined_call_operand.hbm [shape: f32[1,128], index: 2, kind: output, shape index: {}]  }
   0x1   :  { %8 = vsyncpa [#allocation6], 0 }
   0x2   :  { %9 = vsyncpa [#allocation4], 0 }
   0x3   :  { %14 = vsyncadd [#allocation3], 496  ;;  %s202_s9 = smov [#allocation2]   ;;  %s130_s13 = scalar_lea.hbm %s259_s0, 16 }
   0x4   :  { %s15_s10 = sshll.u32 %s202_s9, 4  ;;  %p131_p0 = scmp.ne.s32.totalorder %s259_s0, %s130_s13  ;;  %s16_s10 = int_to_ptr.vmem [resolvable:$true] %s15_s10 }
   0x5   :  { %p134_p1 = scmp.lt.u32.totalorder %s130_s13, %s259_s0 }
   0x7   :  { %p136_p2 = pnand %p134_p1, %p131_p0 }
   0x9   :  { %139 = shalt.err (!%p136_p2)
}
   0xa   :  { %s140_s18 = scalar_lea.vmem %s16_s10, 16  ;;  %s144_s19 = scalar_lea.vmem %s16_s10, 512 }
   0xb   :  { %p141_p3 = scmp.ne.s32.totalorder %s16_s10, %s140_s18  ;;  %p145_p4 = scmp.lt.s32.totalorder %s16_s10, %s16_s10 }
   0xc   :  { %p146_p5 = scmp.lt.s32.totalorder %s144_s19, %s140_s18 }
   0xe   :  { %p147_p6 = por %p146_p5, %p145_p4 }
  0x10   :  { %p148_p7 = pnand %p147_p6, %p141_p3 }
  0x12   :  { %151 = shalt.err (!%p148_p7)
}
  0x13   :  { %s203_s20 = smov 16   ;;  %s204_s21 = smov 1  }
  0x14   :  { %21 = dma.hbm_to_vmem [thread:$0]  %s259_s0, 16, %s16_s10, [#allocation3], %s203_s20, %s203_s20, %s204_s21  }
  0x15   :  { %s205_s24 = smov [#allocation5]   ;;  %s152_s28 = scalar_lea.hbm %s260_s1, 128 }
  0x16   :  { %s28_s25 = sshll.u32 %s205_s24, 4  ;;  %p153_p8 = scmp.ne.s32.totalorder %s260_s1, %s152_s28  ;;  %s29_s25 = int_to_ptr.vmem [resolvable:$true] %s28_s25 }
  0x17   :  { %p156_p9 = scmp.lt.u32.totalorder %s152_s28, %s260_s1 }
  0x19   :  { %p158_p10 = pnand %p156_p9, %p153_p8 }
  0x1b   :  { %161 = shalt.err (!%p158_p10)
}
  0x1c   :  { %s162_s5 = scalar_lea.vmem %s29_s25, 128  ;;  %p167_p12 = scmp.lt.s32.totalorder %s29_s25, %s29_s25 }
  0x1d   :  { %p163_p11 = scmp.ne.s32.totalorder %s29_s25, %s162_s5  ;;  %p168_p13 = scmp.lt.s32.totalorder %s162_s5, %s162_s5 }
  0x1f   :  { %p169_p0 = por %p168_p13, %p167_p12 }
  0x21   :  { %p170_p1 = pnand %p169_p0, %p163_p11 }
  0x23   :  { %173 = shalt.err (!%p170_p1)
}
  0x24   :  { %31 = dma.hbm_to_vmem [thread:$0]  %s260_s1, 128, %s29_s25, [#allocation6]  }
  0x25   :  { %196 = dma.done.wait [#allocation3], 512  }
  0x26   :  { %197 = vsyncadd [#allocation3], 4294966784 }
  0x27   :  { %198 = dma.done.wait [#allocation6], 128  }
  0x28   :  { %199 = vsyncadd [#allocation6], 4294967168  ;;  %v206_v0 = vmov 0.0   ;;  %v43_v1 = vld [vmem:[#allocation2] sm:$0xff]  ;;  %v44_v2 = vld [vmem:[#allocation2 + $0x8] sm:$0xff]  ;;  %s207_s1 = smov [#allocation7]  }
  0x29   :  { %42 = vst [vmem:[#allocation7] sm:$0x1] %v206_v0  ;;  %v45_v3 = vld [vmem:[#allocation2 + $0x10] sm:$0xff]  ;;  %v46_v4 = vld [vmem:[#allocation2 + $0x18] sm:$0xff]  ;;  %v47_v5 = vld [vmem:[#allocation5] sm:$0xff]  ;;  %v56_v6 = vsub.f32 1.0, %v43_v1 }
  0x2a   :  { %v57_v7 = vsub.f32 1.0, %v44_v2  ;;  %v58_v8 = vsub.f32 1.0, %v45_v3  ;;  %v48_v9 = vunpack.c.0.s8 %v47_v5  ;;  %v49_v10 = vunpack.c.1.s8 %v47_v5  ;;  %s106_s7 = sshll.u32 %s207_s1, 4  ;;  %s107_s7 = int_to_ptr.vmem [resolvable:$true] %s106_s7 }
  0x2b   :  { %v50_v11 = vunpack.c.2.s8 %v47_v5  ;;  %v51_v12 = vunpack.c.3.s8 %v47_v5  ;;  %v59_v13 = vsub.f32 1.0, %v46_v4  ;;  %s174_s8 = scalar_lea.vmem %s107_s7, 16  ;;  %s178_s9 = scalar_lea.vmem %s107_s7, 32 }
  0x2c   :  { %vm52_vm0 = vcmp.eq.s32.totalorder %v48_v9, 1  ;;  %vm53_vm1 = vcmp.eq.s32.totalorder %v49_v10, 1  ;;  %vm80_vm4 = vcmp.ne.s32.totalorder %v48_v9, 0  ;;  %vm81_vm5 = vcmp.ne.s32.totalorder %v49_v10, 0  ;;  %p175_p2 = scmp.ne.s32.totalorder %s107_s7, %s174_s8  ;;  %p179_p3 = scmp.lt.s32.totalorder %s107_s7, %s107_s7 }
  0x2d   :  { %vm54_vm2 = vcmp.eq.s32.totalorder %v50_v11, 1  ;;  %vm55_vm3 = vcmp.eq.s32.totalorder %v51_v12, 1  ;;  %v60_v14 = vsel %vm52_vm0, %v43_v1, %v56_v6  ;;  %v61_v15 = vsel %vm53_vm1, %v44_v2, %v57_v7  ;;  %p180_p4 = scmp.lt.s32.totalorder %s178_s9, %s174_s8 }
  0x2e   :  { %v62_v16 = vsel %vm54_vm2, %v45_v3, %v58_v8  ;;  %v63_v17 = vsel %vm55_vm3, %v46_v4, %v59_v13  ;;  %122 = vlog2.f32 %v60_v14  ;;  %vm82_vm6 = vcmp.ne.s32.totalorder %v50_v11, 0 }
  0x2f   :  { %124 = vlog2.f32 %v61_v15  ;;  %vm83_vm7 = vcmp.ne.s32.totalorder %v51_v12, 0  ;;  %p181_p5 = por %p180_p4, %p179_p3 }
  0x30   :  { %126 = vlog2.f32 %v62_v16  ;;  %v88_v46 = vld [vmem:[#allocation7] sm:$0x1] }
  0x31   :  { %128 = vlog2.f32 %v63_v17  ;;  %p182_p6 = pnand %p181_p5, %p175_p2 }
  0x38   :  { %v123_v18 = vpop.eup %122 }
  0x39   :  { %v125_v19 = vpop.eup %124  ;;  %v65_v20 = vmul.f32 0.6931472, %v123_v18 }
  0x3a   :  { %v127_v21 = vpop.eup %126  ;;  %v67_v22 = vmul.f32 0.6931472, %v125_v19 }
  0x3b   :  { %v129_v23 = vpop.eup %128  ;;  %v69_v24 = vmul.f32 0.6931472, %v127_v21  ;;  %v72_v25 = vmax.f32 %v65_v20, -100.0 }
  0x3c   :  { %v71_v26 = vmul.f32 0.6931472, %v129_v23  ;;  %v73_v27 = vmax.f32 %v67_v22, -100.0 }
  0x3d   :  { %v74_v28 = vmax.f32 %v69_v24, -100.0  ;;  %v76_v29 = vsub.f32 0.0, %v72_v25 }
  0x3e   :  { %v75_v30 = vmax.f32 %v71_v26, -100.0  ;;  %v77_v31 = vsub.f32 0.0, %v73_v27 }
  0x3f   :  { %v78_v32 = vsub.f32 0.0, %v74_v28  ;;  %v84_v33 = vsel %vm80_vm4, %v76_v29, 0.0 }
  0x40   :  { %v79_v34 = vsub.f32 0.0, %v75_v30  ;;  %v85_v35 = vsel %vm81_vm5, %v77_v31, 0.0 }
  0x41   :  { %v86_v36 = vsel %vm82_vm6, %v78_v32, 0.0  ;;  %v89_v37 = vadd.f32 %v85_v35, %v84_v33 }
  0x42   :  { %v87_v38 = vsel %vm83_vm7, %v79_v34, 0.0 }
  0x43   :  { %v90_v39 = vadd.f32 %v89_v37, %v86_v36 }
  0x45   :  { %v91_v40 = vadd.f32 %v90_v39, %v87_v38 }
  0x47   :  { %v92_v41 = vrot.slane %v91_v40, 4 }
  0x49   :  { %v93_v42 = vadd.f32 %v92_v41, %v91_v40 }
  0x4b   :  { %v94_v43 = vrot.slane %v93_v42, 2 }
  0x4d   :  { %v95_v44 = vadd.f32 %v94_v43, %v93_v42 }
  0x4f   :  { %v96_v45 = vrot.slane %v95_v44, 1 }
  0x51   :  { %v97_v47 = vadd.f32 %v96_v45, %v95_v44 }
  0x53   :  { %v98_v48 = vadd.f32 %v97_v47, %v88_v46 }
  0x55   :  { %99 = vst [vmem:[#allocation7] sm:$0x1] %v98_v48 }
  0x56   :  { %185 = shalt.err (!%p182_p6)
}
  0x57   :  { %s186_s12 = scalar_lea.hbm %s261_s2, 16 }
  0x58   :  { %p187_p7 = scmp.ne.s32.totalorder %s261_s2, %s186_s12  ;;  %p190_p8 = scmp.lt.u32.totalorder %s186_s12, %s261_s2 }
  0x5a   :  { %p192_p9 = pnand %p190_p8, %p187_p7 }
  0x5c   :  { %195 = shalt.err (!%p192_p9)
}
  0x5d   :  { %109 = dma.vmem_to_hbm [thread:$0]  %s107_s7, 16, %s261_s2, [#allocation4]  }
  0x5e   :  { %200 = dma.done.wait [#allocation4], 16  }
  0x5f   :  { %201 = vsyncadd [#allocation4], 4294967280 }
  0x60   :  { %113 = vsyncpa [#allocation3], 1 }
  0x61   :  { %114 = vsyncpa [#allocation6], 1 }
  0x62   :  { %115 = vsyncpa [#allocation4], 1 }

</bundles_post_ra>
